<compile_context>
chip_gen: v7x
topology: tpu7x:2x2x1
jax: 0.10.0
libtpu: 0.0.40
codegen_flags: <defaults>
</compile_context>

<pallas_src>
import jax
import jax.numpy as jnp
from jax.experimental import pallas as pl
from jax.experimental.pallas import tpu as pltpu

EPS = 1e-5


def down_kernel(xp_ref, w1_ref, g1_ref, bt1_ref, w2_ref, g2_ref, bt2_ref, o_ref):
    # xp_ref : (N, Cin, Lh)       pooled input, lane-dense (no halo)
    # w*_ref : (Cin, 3, Cout, 1)  conv weights, tap-major, per-out-channel column
    # g*/bt* : (1, Cout, 1)       BatchNorm gamma / beta
    # o_ref  : (N, Cout, Lh)      lane-dense output
    n, cin, lh = xp_ref.shape
    cmid = w1_ref.shape[2]
    cout = w2_ref.shape[2]
    inv_nl = 1.0 / float(n * lh)

    xp = xp_ref[...]
    w1 = w1_ref[...]
    w2 = w2_ref[...]

    # 0/1 lane masks for the two wrapped edge columns (computed once, reused
    # by both conv layers; these are the only "padding" ops left).
    lane = jax.lax.broadcasted_iota(jnp.int32, (1, 1, lh), 2)
    mask_l = (lane > 0).astype(jnp.float32)        # kills wrapped x[-1]  at l = 0
    mask_r = (lane < lh - 1).astype(jnp.float32)   # kills wrapped x[Lh]  at l = Lh-1

    def conv3(x, w, c_out):
        """Conv1d(k=3, pad=1), VPU broadcast-MACs, halo-free via XLU rolls."""
        c_in = x.shape[1]

        def tap_terms(ci):
            # One sublane broadcast per input channel; the two shifted taps are
            # rolls of that broadcast (XLU slot, VALU stays free).
            row = jnp.broadcast_to(x[:, ci:ci + 1, :], (n, c_out, lh))
            return (w[ci, 0] * pltpu.roll(row, shift=1, axis=2),       # x[l-1]
                    w[ci, 1] * row,                                     # x[l]
                    w[ci, 2] * pltpu.roll(row, shift=lh - 1, axis=2))   # x[l+1]

        # Three independent per-tap accumulators -> ILP on the 4 VALU slots.
        a0, a1, a2 = tap_terms(0)
        for ci in range(1, c_in):
            t0, t1, t2 = tap_terms(ci)
            a0 = a0 + t0
            a1 = a1 + t1
            a2 = a2 + t2
        # Zero only the single wrapped column of each shifted accumulator
        # (acts as the conv's zero padding), then combine.
        return a1 + a0 * mask_l + a2 * mask_r

    def bn_relu(y, gamma, beta):
        """Training-mode BatchNorm1d (batch stats over N,L) + ReLU, single pass."""
        s = jnp.sum(jnp.sum(y, axis=2, keepdims=True), axis=0, keepdims=True)
        s2 = jnp.sum(jnp.sum(y * y, axis=2, keepdims=True), axis=0, keepdims=True)
        mu = s * inv_nl
        var = jnp.maximum(s2 * inv_nl - mu * mu, 0.0)     # E[y^2] - mean^2, f32
        sc = gamma * jax.lax.rsqrt(var + EPS)             # EUP rsqrt
        sh = beta - mu * sc
        return jnp.maximum(y * sc + sh, 0.0)

    z1 = bn_relu(conv3(xp, w1, cmid), g1_ref[...], bt1_ref[...])
    z2 = bn_relu(conv3(z1, w2, cout), g2_ref[...], bt2_ref[...])
    o_ref[...] = z2.astype(o_ref.dtype)


def _vmem_limit_bytes(n, cin, cmid, cout, lh):
    """Scoped-VMEM limit derived from the actual working set (+2x headroom),
    clamped to [4 MiB, 64 MiB] so it also fits v7x's 64 MiB physical VMEM."""
    f32 = 4
    row = n * lh * f32
    cmax = max(cmid, cout)
    io = 2 * (cin + cout) * row                 # double-buffered in/out windows
    work = (cin + 5 * cmax) * row               # taps + 3 accumulators + activations
    need = 2 * (io + work)
    return int(min(max(need, 4 << 20), 64 << 20))


def down_forward(x_ncl, params):
    """x_ncl: (N, Cin, L) float32 (PyTorch NCL layout). Returns (N, Cout, L // 2)."""
    w1, b1, g1, be1, w2, b2, g2, be2 = params
    del b1, b2  # conv biases cancel exactly under training-mode BatchNorm
    N, Cin, L = x_ncl.shape
    Cmid = w1.shape[0]
    Cout = w2.shape[0]
    Lh = L // 2

    # MaxPool1d(2): a single fused XLA reduce whose result feeds the kernel
    # directly (no halo pad anymore -> no extra HBM write+read of an
    # input-sized array beyond the pooled tensor itself).
    # TODO(synk): for the large-N*L streaming variant, fold the pool in-kernel
    #             (stride-2 lane decimation needs an in-VMEM gather/relayout).
    xp = x_ncl[:, :, :2 * Lh].reshape(N, Cin, Lh, 2).max(axis=-1).astype(jnp.float32)

    # Conv weights (Cout, Cin, 3) -> (Cin, 3, Cout, 1): tap-major, output
    # channels as a per-sublane column that lane-broadcasts in-kernel.
    wt = lambda w: jnp.transpose(w, (1, 2, 0))[..., None].astype(jnp.float32)
    pc = lambda v: v.reshape(1, -1, 1).astype(jnp.float32)

    return pl.pallas_call(
        down_kernel,
        out_shape=jax.ShapeDtypeStruct((N, Cout, Lh), jnp.float32),
        in_specs=[pl.BlockSpec(memory_space=pltpu.MemorySpace.VMEM)] * 7,
        out_specs=pl.BlockSpec(memory_space=pltpu.MemorySpace.VMEM),
        compiler_params=pltpu.CompilerParams(
            vmem_limit_bytes=_vmem_limit_bytes(N, Cin, Cmid, Cout, Lh)),
    )(xp, wt(w1), pc(g1), pc(be1), wt(w2), pc(g2), pc(be2))


def down_reference(x_ncl, params):
    """Pure-JAX reference mirroring the PyTorch forward (NCL layout)."""
    w1, b1, g1, be1, w2, b2, g2, be2 = params
    N, C, L = x_ncl.shape
    Lh = L // 2
    xp = x_ncl[:, :, :2 * Lh].reshape(N, C, Lh, 2).max(axis=-1)     # MaxPool1d(2)

    def conv_bn_relu(h, w, b, g, be):
        y = jax.lax.conv_general_dilated(
            h, w, window_strides=(1,), padding=((1, 1),),
            dimension_numbers=('NCH', 'OIH', 'NCH'),
            precision=jax.lax.Precision.HIGHEST)
        y = y + b[None, :, None]
        mu = y.mean(axis=(0, 2), keepdims=True)
        var = ((y - mu) ** 2).mean(axis=(0, 2), keepdims=True)
        yhat = (y - mu) / jnp.sqrt(var + EPS)
        return jnp.maximum(yhat * g[None, :, None] + be[None, :, None], 0.0)

    h1 = conv_bn_relu(xp, w1, b1, g1, be1)
    return conv_bn_relu(h1, w2, b2, g2, be2)


if __name__ == "__main__":
    # Down(in_channels=4, out_channels=8); DoubleConv => mid_channels = 8
    # L chosen so L // 2 = 128 -> one full lane tile (lane-dense in-kernel tiles).
    N, Cin, L = 2, 4, 256
    Cmid = Cout = 8

    key = jax.random.PRNGKey(0)
    ks = jax.random.split(key, 9)
    w1 = 0.1 * jax.random.normal(ks[0], (Cmid, Cin, 3), jnp.float32)
    b1 = 0.1 * jax.random.normal(ks[1], (Cmid,), jnp.float32)
    g1 = 1.0 + 0.1 * jax.random.normal(ks[2], (Cmid,), jnp.float32)
    be1 = 0.1 * jax.random.normal(ks[3], (Cmid,), jnp.float32)
    w2 = 0.1 * jax.random.normal(ks[4], (Cout, Cmid, 3), jnp.float32)
    b2 = 0.1 * jax.random.normal(ks[5], (Cout,), jnp.float32)
    g2 = 1.0 + 0.1 * jax.random.normal(ks[6], (Cout,), jnp.float32)
    be2 = 0.1 * jax.random.normal(ks[7], (Cout,), jnp.float32)
    params = (w1, b1, g1, be1, w2, b2, g2, be2)

    x = jax.random.normal(ks[8], (N, Cin, L), jnp.float32)   # NCL, like PyTorch

    out = jax.block_until_ready(down_forward(x, params))
    ref = jax.block_until_ready(down_reference(x, params))

    assert out.shape == (N, Cout, L // 2), out.shape
    err = float(jnp.max(jnp.abs(out - ref)))
    assert jnp.allclose(out, ref, atol=2e-4, rtol=2e-4), err
    print("KERNEL_OK")
</pallas_src>

<mosaic_0001>
module attributes {stable_mosaic.version = 11 : i64} {
  func.func @down_kernel(%arg0: memref<2x4x128xf32, #tpu.memory_space<vmem>>, %arg1: memref<4x3x8x1xf32, #tpu.memory_space<vmem>>, %arg2: memref<1x8x1xf32, #tpu.memory_space<vmem>>, %arg3: memref<1x8x1xf32, #tpu.memory_space<vmem>>, %arg4: memref<8x3x8x1xf32, #tpu.memory_space<vmem>>, %arg5: memref<1x8x1xf32, #tpu.memory_space<vmem>>, %arg6: memref<1x8x1xf32, #tpu.memory_space<vmem>>, %arg7: memref<2x8x128xf32, #tpu.memory_space<vmem>>) attributes {dimension_semantics = [], scalar_prefetch = 0 : i64, scratch_operands = 0 : i64, tpu.core_type = #tpu.core_type<tc>} {
    %c0 = arith.constant 0 : index
    %c0_0 = arith.constant 0 : index
    %c0_1 = arith.constant 0 : index
    %0 = vector.load %arg0[%c0, %c0_0, %c0_1] : memref<2x4x128xf32, #tpu.memory_space<vmem>>, vector<2x4x128xf32>
    %c0_2 = arith.constant 0 : index
    %c0_3 = arith.constant 0 : index
    %c0_4 = arith.constant 0 : index
    %c0_5 = arith.constant 0 : index
    %1 = vector.load %arg1[%c0_2, %c0_3, %c0_4, %c0_5] : memref<4x3x8x1xf32, #tpu.memory_space<vmem>>, vector<4x3x8x1xf32>
    %c0_6 = arith.constant 0 : index
    %c0_7 = arith.constant 0 : index
    %c0_8 = arith.constant 0 : index
    %c0_9 = arith.constant 0 : index
    %2 = vector.load %arg4[%c0_6, %c0_7, %c0_8, %c0_9] : memref<8x3x8x1xf32, #tpu.memory_space<vmem>>, vector<8x3x8x1xf32>
    %3 = tpu.iota {dimensions = array<i32: 2>} : vector<1x1x128xi32>
    %c0_i32 = arith.constant 0 : i32
    %4 = vector.broadcast %c0_i32 : i32 to vector<1x1x128xi32>
    %5 = arith.cmpi sgt, %3, %4 : vector<1x1x128xi32>
    %6 = arith.extui %5 : vector<1x1x128xi1> to vector<1x1x128xi32>
    %7 = arith.sitofp %6 : vector<1x1x128xi32> to vector<1x1x128xf32>
    %c127_i32 = arith.constant 127 : i32
    %8 = vector.broadcast %c127_i32 : i32 to vector<1x1x128xi32>
    %9 = arith.cmpi slt, %3, %8 : vector<1x1x128xi32>
    %10 = arith.extui %9 : vector<1x1x128xi1> to vector<1x1x128xi32>
    %11 = arith.sitofp %10 : vector<1x1x128xi32> to vector<1x1x128xf32>
    %12 = vector.extract_strided_slice %0 {offsets = [0, 0, 0], sizes = [2, 1, 128], strides = [1, 1, 1]} : vector<2x4x128xf32> to vector<2x1x128xf32>
    %13 = vector.shape_cast %12 : vector<2x1x128xf32> to vector<2x1x128xf32>
    %14 = vector.broadcast %13 : vector<2x1x128xf32> to vector<2x8x128xf32>
    %15 = vector.extract_strided_slice %1 {offsets = [0, 0, 0, 0], sizes = [1, 1, 8, 1], strides = [1, 1, 1, 1]} : vector<4x3x8x1xf32> to vector<1x1x8x1xf32>
    %16 = vector.shape_cast %15 : vector<1x1x8x1xf32> to vector<8x1xf32>
    %c1_i32 = arith.constant 1 : i32
    %17 = tpu.dynamic_rotate %14 by %c1_i32 dim 2 : vector<2x8x128xf32>, i32 -> vector<2x8x128xf32>
    %18 = vector.shape_cast %16 : vector<8x1xf32> to vector<1x8x1xf32>
    %19 = vector.broadcast %18 : vector<1x8x1xf32> to vector<2x8x128xf32>
    %20 = arith.mulf %19, %17 : vector<2x8x128xf32>
    %21 = vector.extract_strided_slice %1 {offsets = [0, 1, 0, 0], sizes = [1, 1, 8, 1], strides = [1, 1, 1, 1]} : vector<4x3x8x1xf32> to vector<1x1x8x1xf32>
    %22 = vector.shape_cast %21 : vector<1x1x8x1xf32> to vector<8x1xf32>
    %23 = vector.shape_cast %22 : vector<8x1xf32> to vector<1x8x1xf32>
    %24 = vector.broadcast %23 : vector<1x8x1xf32> to vector<2x8x128xf32>
    %25 = arith.mulf %24, %14 : vector<2x8x128xf32>
    %26 = vector.extract_strided_slice %1 {offsets = [0, 2, 0, 0], sizes = [1, 1, 8, 1], strides = [1, 1, 1, 1]} : vector<4x3x8x1xf32> to vector<1x1x8x1xf32>
    %27 = vector.shape_cast %26 : vector<1x1x8x1xf32> to vector<8x1xf32>
    %c127_i32_10 = arith.constant 127 : i32
    %28 = tpu.dynamic_rotate %14 by %c127_i32_10 dim 2 : vector<2x8x128xf32>, i32 -> vector<2x8x128xf32>
    %29 = vector.shape_cast %27 : vector<8x1xf32> to vector<1x8x1xf32>
    %30 = vector.broadcast %29 : vector<1x8x1xf32> to vector<2x8x128xf32>
    %31 = arith.mulf %30, %28 : vector<2x8x128xf32>
    %32 = vector.extract_strided_slice %0 {offsets = [0, 1, 0], sizes = [2, 1, 128], strides = [1, 1, 1]} : vector<2x4x128xf32> to vector<2x1x128xf32>
    %33 = vector.shape_cast %32 : vector<2x1x128xf32> to vector<2x1x128xf32>
    %34 = vector.broadcast %33 : vector<2x1x128xf32> to vector<2x8x128xf32>
    %35 = vector.extract_strided_slice %1 {offsets = [1, 0, 0, 0], sizes = [1, 1, 8, 1], strides = [1, 1, 1, 1]} : vector<4x3x8x1xf32> to vector<1x1x8x1xf32>
    %36 = vector.shape_cast %35 : vector<1x1x8x1xf32> to vector<8x1xf32>
    %c1_i32_11 = arith.constant 1 : i32
    %37 = tpu.dynamic_rotate %34 by %c1_i32_11 dim 2 : vector<2x8x128xf32>, i32 -> vector<2x8x128xf32>
    %38 = vector.shape_cast %36 : vector<8x1xf32> to vector<1x8x1xf32>
    %39 = vector.broadcast %38 : vector<1x8x1xf32> to vector<2x8x128xf32>
    %40 = arith.mulf %39, %37 : vector<2x8x128xf32>
    %41 = vector.extract_strided_slice %1 {offsets = [1, 1, 0, 0], sizes = [1, 1, 8, 1], strides = [1, 1, 1, 1]} : vector<4x3x8x1xf32> to vector<1x1x8x1xf32>
    %42 = vector.shape_cast %41 : vector<1x1x8x1xf32> to vector<8x1xf32>
    %43 = vector.shape_cast %42 : vector<8x1xf32> to vector<1x8x1xf32>
    %44 = vector.broadcast %43 : vector<1x8x1xf32> to vector<2x8x128xf32>
    %45 = arith.mulf %44, %34 : vector<2x8x128xf32>
    %46 = vector.extract_strided_slice %1 {offsets = [1, 2, 0, 0], sizes = [1, 1, 8, 1], strides = [1, 1, 1, 1]} : vector<4x3x8x1xf32> to vector<1x1x8x1xf32>
    %47 = vector.shape_cast %46 : vector<1x1x8x1xf32> to vector<8x1xf32>
    %c127_i32_12 = arith.constant 127 : i32
    %48 = tpu.dynamic_rotate %34 by %c127_i32_12 dim 2 : vector<2x8x128xf32>, i32 -> vector<2x8x128xf32>
    %49 = vector.shape_cast %47 : vector<8x1xf32> to vector<1x8x1xf32>
    %50 = vector.broadcast %49 : vector<1x8x1xf32> to vector<2x8x128xf32>
    %51 = arith.mulf %50, %48 : vector<2x8x128xf32>
    %52 = arith.addf %20, %40 : vector<2x8x128xf32>
    %53 = arith.addf %25, %45 : vector<2x8x128xf32>
    %54 = arith.addf %31, %51 : vector<2x8x128xf32>
    %55 = vector.extract_strided_slice %0 {offsets = [0, 2, 0], sizes = [2, 1, 128], strides = [1, 1, 1]} : vector<2x4x128xf32> to vector<2x1x128xf32>
    %56 = vector.shape_cast %55 : vector<2x1x128xf32> to vector<2x1x128xf32>
    %57 = vector.broadcast %56 : vector<2x1x128xf32> to vector<2x8x128xf32>
    %58 = vector.extract_strided_slice %1 {offsets = [2, 0, 0, 0], sizes = [1, 1, 8, 1], strides = [1, 1, 1, 1]} : vector<4x3x8x1xf32> to vector<1x1x8x1xf32>
    %59 = vector.shape_cast %58 : vector<1x1x8x1xf32> to vector<8x1xf32>
    %c1_i32_13 = arith.constant 1 : i32
    %60 = tpu.dynamic_rotate %57 by %c1_i32_13 dim 2 : vector<2x8x128xf32>, i32 -> vector<2x8x128xf32>
    %61 = vector.shape_cast %59 : vector<8x1xf32> to vector<1x8x1xf32>
    %62 = vector.broadcast %61 : vector<1x8x1xf32> to vector<2x8x128xf32>
    %63 = arith.mulf %62, %60 : vector<2x8x128xf32>
    %64 = vector.extract_strided_slice %1 {offsets = [2, 1, 0, 0], sizes = [1, 1, 8, 1], strides = [1, 1, 1, 1]} : vector<4x3x8x1xf32> to vector<1x1x8x1xf32>
    %65 = vector.shape_cast %64 : vector<1x1x8x1xf32> to vector<8x1xf32>
    %66 = vector.shape_cast %65 : vector<8x1xf32> to vector<1x8x1xf32>
    %67 = vector.broadcast %66 : vector<1x8x1xf32> to vector<2x8x128xf32>
    %68 = arith.mulf %67, %57 : vector<2x8x128xf32>
    %69 = vector.extract_strided_slice %1 {offsets = [2, 2, 0, 0], sizes = [1, 1, 8, 1], strides = [1, 1, 1, 1]} : vector<4x3x8x1xf32> to vector<1x1x8x1xf32>
    %70 = vector.shape_cast %69 : vector<1x1x8x1xf32> to vector<8x1xf32>
    %c127_i32_14 = arith.constant 127 : i32
    %71 = tpu.dynamic_rotate %57 by %c127_i32_14 dim 2 : vector<2x8x128xf32>, i32 -> vector<2x8x128xf32>
    %72 = vector.shape_cast %70 : vector<8x1xf32> to vector<1x8x1xf32>
    %73 = vector.broadcast %72 : vector<1x8x1xf32> to vector<2x8x128xf32>
    %74 = arith.mulf %73, %71 : vector<2x8x128xf32>
    %75 = arith.addf %52, %63 : vector<2x8x128xf32>
    %76 = arith.addf %53, %68 : vector<2x8x128xf32>
    %77 = arith.addf %54, %74 : vector<2x8x128xf32>
    %78 = vector.extract_strided_slice %0 {offsets = [0, 3, 0], sizes = [2, 1, 128], strides = [1, 1, 1]} : vector<2x4x128xf32> to vector<2x1x128xf32>
    %79 = vector.shape_cast %78 : vector<2x1x128xf32> to vector<2x1x128xf32>
    %80 = vector.broadcast %79 : vector<2x1x128xf32> to vector<2x8x128xf32>
    %81 = vector.extract_strided_slice %1 {offsets = [3, 0, 0, 0], sizes = [1, 1, 8, 1], strides = [1, 1, 1, 1]} : vector<4x3x8x1xf32> to vector<1x1x8x1xf32>
    %82 = vector.shape_cast %81 : vector<1x1x8x1xf32> to vector<8x1xf32>
    %c1_i32_15 = arith.constant 1 : i32
    %83 = tpu.dynamic_rotate %80 by %c1_i32_15 dim 2 : vector<2x8x128xf32>, i32 -> vector<2x8x128xf32>
    %84 = vector.shape_cast %82 : vector<8x1xf32> to vector<1x8x1xf32>
    %85 = vector.broadcast %84 : vector<1x8x1xf32> to vector<2x8x128xf32>
    %86 = arith.mulf %85, %83 : vector<2x8x128xf32>
    %87 = vector.extract_strided_slice %1 {offsets = [3, 1, 0, 0], sizes = [1, 1, 8, 1], strides = [1, 1, 1, 1]} : vector<4x3x8x1xf32> to vector<1x1x8x1xf32>
    %88 = vector.shape_cast %87 : vector<1x1x8x1xf32> to vector<8x1xf32>
    %89 = vector.shape_cast %88 : vector<8x1xf32> to vector<1x8x1xf32>
    %90 = vector.broadcast %89 : vector<1x8x1xf32> to vector<2x8x128xf32>
    %91 = arith.mulf %90, %80 : vector<2x8x128xf32>
    %92 = vector.extract_strided_slice %1 {offsets = [3, 2, 0, 0], sizes = [1, 1, 8, 1], strides = [1, 1, 1, 1]} : vector<4x3x8x1xf32> to vector<1x1x8x1xf32>
    %93 = vector.shape_cast %92 : vector<1x1x8x1xf32> to vector<8x1xf32>
    %c127_i32_16 = arith.constant 127 : i32
    %94 = tpu.dynamic_rotate %80 by %c127_i32_16 dim 2 : vector<2x8x128xf32>, i32 -> vector<2x8x128xf32>
    %95 = vector.shape_cast %93 : vector<8x1xf32> to vector<1x8x1xf32>
    %96 = vector.broadcast %95 : vector<1x8x1xf32> to vector<2x8x128xf32>
    %97 = arith.mulf %96, %94 : vector<2x8x128xf32>
    %98 = arith.addf %75, %86 : vector<2x8x128xf32>
    %99 = arith.addf %76, %91 : vector<2x8x128xf32>
    %100 = arith.addf %77, %97 : vector<2x8x128xf32>
    %101 = vector.broadcast %7 : vector<1x1x128xf32> to vector<2x8x128xf32>
    %102 = arith.mulf %98, %101 : vector<2x8x128xf32>
    %103 = arith.addf %99, %102 : vector<2x8x128xf32>
    %104 = vector.broadcast %11 : vector<1x1x128xf32> to vector<2x8x128xf32>
    %105 = arith.mulf %100, %104 : vector<2x8x128xf32>
    %106 = arith.addf %103, %105 : vector<2x8x128xf32>
    %c0_17 = arith.constant 0 : index
    %c0_18 = arith.constant 0 : index
    %c0_19 = arith.constant 0 : index
    %107 = vector.load %arg2[%c0_17, %c0_18, %c0_19] : memref<1x8x1xf32, #tpu.memory_space<vmem>>, vector<1x8x1xf32>
    %c0_20 = arith.constant 0 : index
    %c0_21 = arith.constant 0 : index
    %c0_22 = arith.constant 0 : index
    %108 = vector.load %arg3[%c0_20, %c0_21, %c0_22] : memref<1x8x1xf32, #tpu.memory_space<vmem>>, vector<1x8x1xf32>
    %cst = arith.constant dense<0.000000e+00> : vector<2x8xf32>
    %109 = vector.multi_reduction <add>, %106, %cst [2] : vector<2x8x128xf32> to vector<2x8xf32>
    %110 = vector.shape_cast %109 : vector<2x8xf32> to vector<2x8x1xf32>
    %cst_23 = arith.constant dense<0.000000e+00> : vector<8x1xf32>
    %111 = vector.multi_reduction <add>, %110, %cst_23 [0] : vector<2x8x1xf32> to vector<8x1xf32>
    %112 = vector.shape_cast %111 : vector<8x1xf32> to vector<1x8x1xf32>
    %113 = arith.mulf %106, %106 : vector<2x8x128xf32>
    %cst_24 = arith.constant dense<0.000000e+00> : vector<2x8xf32>
    %114 = vector.multi_reduction <add>, %113, %cst_24 [2] : vector<2x8x128xf32> to vector<2x8xf32>
    %115 = vector.shape_cast %114 : vector<2x8xf32> to vector<2x8x1xf32>
    %cst_25 = arith.constant dense<0.000000e+00> : vector<8x1xf32>
    %116 = vector.multi_reduction <add>, %115, %cst_25 [0] : vector<2x8x1xf32> to vector<8x1xf32>
    %117 = vector.shape_cast %116 : vector<8x1xf32> to vector<1x8x1xf32>
    %cst_26 = arith.constant 3.906250e-03 : f32
    %118 = vector.broadcast %cst_26 : f32 to vector<1x8x1xf32>
    %119 = arith.mulf %112, %118 : vector<1x8x1xf32>
    %cst_27 = arith.constant 3.906250e-03 : f32
    %120 = vector.broadcast %cst_27 : f32 to vector<1x8x1xf32>
    %121 = arith.mulf %117, %120 : vector<1x8x1xf32>
    %122 = arith.mulf %119, %119 : vector<1x8x1xf32>
    %123 = arith.subf %121, %122 : vector<1x8x1xf32>
    %cst_28 = arith.constant 0.000000e+00 : f32
    %124 = vector.broadcast %cst_28 : f32 to vector<1x8x1xf32>
    %125 = arith.maximumf %123, %124 : vector<1x8x1xf32>
    %cst_29 = arith.constant 9.99999974E-6 : f32
    %126 = vector.broadcast %cst_29 : f32 to vector<1x8x1xf32>
    %127 = arith.addf %125, %126 : vector<1x8x1xf32>
    %128 = math.rsqrt %127 : vector<1x8x1xf32>
    %129 = arith.mulf %107, %128 : vector<1x8x1xf32>
    %130 = arith.mulf %119, %129 : vector<1x8x1xf32>
    %131 = arith.subf %108, %130 : vector<1x8x1xf32>
    %132 = vector.broadcast %129 : vector<1x8x1xf32> to vector<2x8x128xf32>
    %133 = arith.mulf %106, %132 : vector<2x8x128xf32>
    %134 = vector.broadcast %131 : vector<1x8x1xf32> to vector<2x8x128xf32>
    %135 = arith.addf %133, %134 : vector<2x8x128xf32>
    %cst_30 = arith.constant 0.000000e+00 : f32
    %136 = vector.broadcast %cst_30 : f32 to vector<2x8x128xf32>
    %137 = arith.maximumf %135, %136 : vector<2x8x128xf32>
    %138 = vector.extract_strided_slice %137 {offsets = [0, 0, 0], sizes = [2, 1, 128], strides = [1, 1, 1]} : vector<2x8x128xf32> to vector<2x1x128xf32>
    %139 = vector.shape_cast %138 : vector<2x1x128xf32> to vector<2x1x128xf32>
    %140 = vector.broadcast %139 : vector<2x1x128xf32> to vector<2x8x128xf32>
    %141 = vector.extract_strided_slice %2 {offsets = [0, 0, 0, 0], sizes = [1, 1, 8, 1], strides = [1, 1, 1, 1]} : vector<8x3x8x1xf32> to vector<1x1x8x1xf32>
    %142 = vector.shape_cast %141 : vector<1x1x8x1xf32> to vector<8x1xf32>
    %c1_i32_31 = arith.constant 1 : i32
    %143 = tpu.dynamic_rotate %140 by %c1_i32_31 dim 2 : vector<2x8x128xf32>, i32 -> vector<2x8x128xf32>
    %144 = vector.shape_cast %142 : vector<8x1xf32> to vector<1x8x1xf32>
    %145 = vector.broadcast %144 : vector<1x8x1xf32> to vector<2x8x128xf32>
    %146 = arith.mulf %145, %143 : vector<2x8x128xf32>
    %147 = vector.extract_strided_slice %2 {offsets = [0, 1, 0, 0], sizes = [1, 1, 8, 1], strides = [1, 1, 1, 1]} : vector<8x3x8x1xf32> to vector<1x1x8x1xf32>
    %148 = vector.shape_cast %147 : vector<1x1x8x1xf32> to vector<8x1xf32>
    %149 = vector.shape_cast %148 : vector<8x1xf32> to vector<1x8x1xf32>
    %150 = vector.broadcast %149 : vector<1x8x1xf32> to vector<2x8x128xf32>
    %151 = arith.mulf %150, %140 : vector<2x8x128xf32>
    %152 = vector.extract_strided_slice %2 {offsets = [0, 2, 0, 0], sizes = [1, 1, 8, 1], strides = [1, 1, 1, 1]} : vector<8x3x8x1xf32> to vector<1x1x8x1xf32>
    %153 = vector.shape_cast %152 : vector<1x1x8x1xf32> to vector<8x1xf32>
    %c127_i32_32 = arith.constant 127 : i32
    %154 = tpu.dynamic_rotate %140 by %c127_i32_32 dim 2 : vector<2x8x128xf32>, i32 -> vector<2x8x128xf32>
    %155 = vector.shape_cast %153 : vector<8x1xf32> to vector<1x8x1xf32>
    %156 = vector.broadcast %155 : vector<1x8x1xf32> to vector<2x8x128xf32>
    %157 = arith.mulf %156, %154 : vector<2x8x128xf32>
    %158 = vector.extract_strided_slice %137 {offsets = [0, 1, 0], sizes = [2, 1, 128], strides = [1, 1, 1]} : vector<2x8x128xf32> to vector<2x1x128xf32>
    %159 = vector.shape_cast %158 : vector<2x1x128xf32> to vector<2x1x128xf32>
    %160 = vector.broadcast %159 : vector<2x1x128xf32> to vector<2x8x128xf32>
    %161 = vector.extract_strided_slice %2 {offsets = [1, 0, 0, 0], sizes = [1, 1, 8, 1], strides = [1, 1, 1, 1]} : vector<8x3x8x1xf32> to vector<1x1x8x1xf32>
    %162 = vector.shape_cast %161 : vector<1x1x8x1xf32> to vector<8x1xf32>
    %c1_i32_33 = arith.constant 1 : i32
    %163 = tpu.dynamic_rotate %160 by %c1_i32_33 dim 2 : vector<2x8x128xf32>, i32 -> vector<2x8x128xf32>
    %164 = vector.shape_cast %162 : vector<8x1xf32> to vector<1x8x1xf32>
    %165 = vector.broadcast %164 : vector<1x8x1xf32> to vector<2x8x128xf32>
    %166 = arith.mulf %165, %163 : vector<2x8x128xf32>
    %167 = vector.extract_strided_slice %2 {offsets = [1, 1, 0, 0], sizes = [1, 1, 8, 1], strides = [1, 1, 1, 1]} : vector<8x3x8x1xf32> to vector<1x1x8x1xf32>
    %168 = vector.shape_cast %167 : vector<1x1x8x1xf32> to vector<8x1xf32>
    %169 = vector.shape_cast %168 : vector<8x1xf32> to vector<1x8x1xf32>
    %170 = vector.broadcast %169 : vector<1x8x1xf32> to vector<2x8x128xf32>
    %171 = arith.mulf %170, %160 : vector<2x8x128xf32>
    %172 = vector.extract_strided_slice %2 {offsets = [1, 2, 0, 0], sizes = [1, 1, 8, 1], strides = [1, 1, 1, 1]} : vector<8x3x8x1xf32> to vector<1x1x8x1xf32>
    %173 = vector.shape_cast %172 : vector<1x1x8x1xf32> to vector<8x1xf32>
    %c127_i32_34 = arith.constant 127 : i32
    %174 = tpu.dynamic_rotate %160 by %c127_i32_34 dim 2 : vector<2x8x128xf32>, i32 -> vector<2x8x128xf32>
    %175 = vector.shape_cast %173 : vector<8x1xf32> to vector<1x8x1xf32>
    %176 = vector.broadcast %175 : vector<1x8x1xf32> to vector<2x8x128xf32>
    %177 = arith.mulf %176, %174 : vector<2x8x128xf32>
    %178 = arith.addf %146, %166 : vector<2x8x128xf32>
    %179 = arith.addf %151, %171 : vector<2x8x128xf32>
    %180 = arith.addf %157, %177 : vector<2x8x128xf32>
    %181 = vector.extract_strided_slice %137 {offsets = [0, 2, 0], sizes = [2, 1, 128], strides = [1, 1, 1]} : vector<2x8x128xf32> to vector<2x1x128xf32>
    %182 = vector.shape_cast %181 : vector<2x1x128xf32> to vector<2x1x128xf32>
    %183 = vector.broadcast %182 : vector<2x1x128xf32> to vector<2x8x128xf32>
    %184 = vector.extract_strided_slice %2 {offsets = [2, 0, 0, 0], sizes = [1, 1, 8, 1], strides = [1, 1, 1, 1]} : vector<8x3x8x1xf32> to vector<1x1x8x1xf32>
    %185 = vector.shape_cast %184 : vector<1x1x8x1xf32> to vector<8x1xf32>
    %c1_i32_35 = arith.constant 1 : i32
    %186 = tpu.dynamic_rotate %183 by %c1_i32_35 dim 2 : vector<2x8x128xf32>, i32 -> vector<2x8x128xf32>
    %187 = vector.shape_cast %185 : vector<8x1xf32> to vector<1x8x1xf32>
    %188 = vector.broadcast %187 : vector<1x8x1xf32> to vector<2x8x128xf32>
    %189 = arith.mulf %188, %186 : vector<2x8x128xf32>
    %190 = vector.extract_strided_slice %2 {offsets = [2, 1, 0, 0], sizes = [1, 1, 8, 1], strides = [1, 1, 1, 1]} : vector<8x3x8x1xf32> to vector<1x1x8x1xf32>
    %191 = vector.shape_cast %190 : vector<1x1x8x1xf32> to vector<8x1xf32>
    %192 = vector.shape_cast %191 : vector<8x1xf32> to vector<1x8x1xf32>
    %193 = vector.broadcast %192 : vector<1x8x1xf32> to vector<2x8x128xf32>
    %194 = arith.mulf %193, %183 : vector<2x8x128xf32>
    %195 = vector.extract_strided_slice %2 {offsets = [2, 2, 0, 0], sizes = [1, 1, 8, 1], strides = [1, 1, 1, 1]} : vector<8x3x8x1xf32> to vector<1x1x8x1xf32>
    %196 = vector.shape_cast %195 : vector<1x1x8x1xf32> to vector<8x1xf32>
    %c127_i32_36 = arith.constant 127 : i32
    %197 = tpu.dynamic_rotate %183 by %c127_i32_36 dim 2 : vector<2x8x128xf32>, i32 -> vector<2x8x128xf32>
    %198 = vector.shape_cast %196 : vector<8x1xf32> to vector<1x8x1xf32>
    %199 = vector.broadcast %198 : vector<1x8x1xf32> to vector<2x8x128xf32>
    %200 = arith.mulf %199, %197 : vector<2x8x128xf32>
    %201 = arith.addf %178, %189 : vector<2x8x128xf32>
    %202 = arith.addf %179, %194 : vector<2x8x128xf32>
    %203 = arith.addf %180, %200 : vector<2x8x128xf32>
    %204 = vector.extract_strided_slice %137 {offsets = [0, 3, 0], sizes = [2, 1, 128], strides = [1, 1, 1]} : vector<2x8x128xf32> to vector<2x1x128xf32>
    %205 = vector.shape_cast %204 : vector<2x1x128xf32> to vector<2x1x128xf32>
    %206 = vector.broadcast %205 : vector<2x1x128xf32> to vector<2x8x128xf32>
    %207 = vector.extract_strided_slice %2 {offsets = [3, 0, 0, 0], sizes = [1, 1, 8, 1], strides = [1, 1, 1, 1]} : vector<8x3x8x1xf32> to vector<1x1x8x1xf32>
    %208 = vector.shape_cast %207 : vector<1x1x8x1xf32> to vector<8x1xf32>
    %c1_i32_37 = arith.constant 1 : i32
    %209 = tpu.dynamic_rotate %206 by %c1_i32_37 dim 2 : vector<2x8x128xf32>, i32 -> vector<2x8x128xf32>
    %210 = vector.shape_cast %208 : vector<8x1xf32> to vector<1x8x1xf32>
    %211 = vector.broadcast %210 : vector<1x8x1xf32> to vector<2x8x128xf32>
    %212 = arith.mulf %211, %209 : vector<2x8x128xf32>
    %213 = vector.extract_strided_slice %2 {offsets = [3, 1, 0, 0], sizes = [1, 1, 8, 1], strides = [1, 1, 1, 1]} : vector<8x3x8x1xf32> to vector<1x1x8x1xf32>
    %214 = vector.shape_cast %213 : vector<1x1x8x1xf32> to vector<8x1xf32>
    %215 = vector.shape_cast %214 : vector<8x1xf32> to vector<1x8x1xf32>
    %216 = vector.broadcast %215 : vector<1x8x1xf32> to vector<2x8x128xf32>
    %217 = arith.mulf %216, %206 : vector<2x8x128xf32>
    %218 = vector.extract_strided_slice %2 {offsets = [3, 2, 0, 0], sizes = [1, 1, 8, 1], strides = [1, 1, 1, 1]} : vector<8x3x8x1xf32> to vector<1x1x8x1xf32>
    %219 = vector.shape_cast %218 : vector<1x1x8x1xf32> to vector<8x1xf32>
    %c127_i32_38 = arith.constant 127 : i32
    %220 = tpu.dynamic_rotate %206 by %c127_i32_38 dim 2 : vector<2x8x128xf32>, i32 -> vector<2x8x128xf32>
    %221 = vector.shape_cast %219 : vector<8x1xf32> to vector<1x8x1xf32>
    %222 = vector.broadcast %221 : vector<1x8x1xf32> to vector<2x8x128xf32>
    %223 = arith.mulf %222, %220 : vector<2x8x128xf32>
    %224 = arith.addf %201, %212 : vector<2x8x128xf32>
    %225 = arith.addf %202, %217 : vector<2x8x128xf32>
    %226 = arith.addf %203, %223 : vector<2x8x128xf32>
    %227 = vector.extract_strided_slice %137 {offsets = [0, 4, 0], sizes = [2, 1, 128], strides = [1, 1, 1]} : vector<2x8x128xf32> to vector<2x1x128xf32>
    %228 = vector.shape_cast %227 : vector<2x1x128xf32> to vector<2x1x128xf32>
    %229 = vector.broadcast %228 : vector<2x1x128xf32> to vector<2x8x128xf32>
    %230 = vector.extract_strided_slice %2 {offsets = [4, 0, 0, 0], sizes = [1, 1, 8, 1], strides = [1, 1, 1, 1]} : vector<8x3x8x1xf32> to vector<1x1x8x1xf32>
    %231 = vector.shape_cast %230 : vector<1x1x8x1xf32> to vector<8x1xf32>
    %c1_i32_39 = arith.constant 1 : i32
    %232 = tpu.dynamic_rotate %229 by %c1_i32_39 dim 2 : vector<2x8x128xf32>, i32 -> vector<2x8x128xf32>
    %233 = vector.shape_cast %231 : vector<8x1xf32> to vector<1x8x1xf32>
    %234 = vector.broadcast %233 : vector<1x8x1xf32> to vector<2x8x128xf32>
    %235 = arith.mulf %234, %232 : vector<2x8x128xf32>
    %236 = vector.extract_strided_slice %2 {offsets = [4, 1, 0, 0], sizes = [1, 1, 8, 1], strides = [1, 1, 1, 1]} : vector<8x3x8x1xf32> to vector<1x1x8x1xf32>
    %237 = vector.shape_cast %236 : vector<1x1x8x1xf32> to vector<8x1xf32>
    %238 = vector.shape_cast %237 : vector<8x1xf32> to vector<1x8x1xf32>
    %239 = vector.broadcast %238 : vector<1x8x1xf32> to vector<2x8x128xf32>
    %240 = arith.mulf %239, %229 : vector<2x8x128xf32>
    %241 = vector.extract_strided_slice %2 {offsets = [4, 2, 0, 0], sizes = [1, 1, 8, 1], strides = [1, 1, 1, 1]} : vector<8x3x8x1xf32> to vector<1x1x8x1xf32>
    %242 = vector.shape_cast %241 : vector<1x1x8x1xf32> to vector<8x1xf32>
    %c127_i32_40 = arith.constant 127 : i32
    %243 = tpu.dynamic_rotate %229 by %c127_i32_40 dim 2 : vector<2x8x128xf32>, i32 -> vector<2x8x128xf32>
    %244 = vector.shape_cast %242 : vector<8x1xf32> to vector<1x8x1xf32>
    %245 = vector.broadcast %244 : vector<1x8x1xf32> to vector<2x8x128xf32>
    %246 = arith.mulf %245, %243 : vector<2x8x128xf32>
    %247 = arith.addf %224, %235 : vector<2x8x128xf32>
    %248 = arith.addf %225, %240 : vector<2x8x128xf32>
    %249 = arith.addf %226, %246 : vector<2x8x128xf32>
    %250 = vector.extract_strided_slice %137 {offsets = [0, 5, 0], sizes = [2, 1, 128], strides = [1, 1, 1]} : vector<2x8x128xf32> to vector<2x1x128xf32>
    %251 = vector.shape_cast %250 : vector<2x1x128xf32> to vector<2x1x128xf32>
    %252 = vector.broadcast %251 : vector<2x1x128xf32> to vector<2x8x128xf32>
    %253 = vector.extract_strided_slice %2 {offsets = [5, 0, 0, 0], sizes = [1, 1, 8, 1], strides = [1, 1, 1, 1]} : vector<8x3x8x1xf32> to vector<1x1x8x1xf32>
    %254 = vector.shape_cast %253 : vector<1x1x8x1xf32> to vector<8x1xf32>
    %c1_i32_41 = arith.constant 1 : i32
    %255 = tpu.dynamic_rotate %252 by %c1_i32_41 dim 2 : vector<2x8x128xf32>, i32 -> vector<2x8x128xf32>
    %256 = vector.shape_cast %254 : vector<8x1xf32> to vector<1x8x1xf32>
    %257 = vector.broadcast %256 : vector<1x8x1xf32> to vector<2x8x128xf32>
    %258 = arith.mulf %257, %255 : vector<2x8x128xf32>
    %259 = vector.extract_strided_slice %2 {offsets = [5, 1, 0, 0], sizes = [1, 1, 8, 1], strides = [1, 1, 1, 1]} : vector<8x3x8x1xf32> to vector<1x1x8x1xf32>
    %260 = vector.shape_cast %259 : vector<1x1x8x1xf32> to vector<8x1xf32>
    %261 = vector.shape_cast %260 : vector<8x1xf32> to vector<1x8x1xf32>
    %262 = vector.broadcast %261 : vector<1x8x1xf32> to vector<2x8x128xf32>
    %263 = arith.mulf %262, %252 : vector<2x8x128xf32>
    %264 = vector.extract_strided_slice %2 {offsets = [5, 2, 0, 0], sizes = [1, 1, 8, 1], strides = [1, 1, 1, 1]} : vector<8x3x8x1xf32> to vector<1x1x8x1xf32>
    %265 = vector.shape_cast %264 : vector<1x1x8x1xf32> to vector<8x1xf32>
    %c127_i32_42 = arith.constant 127 : i32
    %266 = tpu.dynamic_rotate %252 by %c127_i32_42 dim 2 : vector<2x8x128xf32>, i32 -> vector<2x8x128xf32>
    %267 = vector.shape_cast %265 : vector<8x1xf32> to vector<1x8x1xf32>
    %268 = vector.broadcast %267 : vector<1x8x1xf32> to vector<2x8x128xf32>
    %269 = arith.mulf %268, %266 : vector<2x8x128xf32>
    %270 = arith.addf %247, %258 : vector<2x8x128xf32>
    %271 = arith.addf %248, %263 : vector<2x8x128xf32>
    %272 = arith.addf %249, %269 : vector<2x8x128xf32>
    %273 = vector.extract_strided_slice %137 {offsets = [0, 6, 0], sizes = [2, 1, 128], strides = [1, 1, 1]} : vector<2x8x128xf32> to vector<2x1x128xf32>
    %274 = vector.shape_cast %273 : vector<2x1x128xf32> to vector<2x1x128xf32>
    %275 = vector.broadcast %274 : vector<2x1x128xf32> to vector<2x8x128xf32>
    %276 = vector.extract_strided_slice %2 {offsets = [6, 0, 0, 0], sizes = [1, 1, 8, 1], strides = [1, 1, 1, 1]} : vector<8x3x8x1xf32> to vector<1x1x8x1xf32>
    %277 = vector.shape_cast %276 : vector<1x1x8x1xf32> to vector<8x1xf32>
    %c1_i32_43 = arith.constant 1 : i32
    %278 = tpu.dynamic_rotate %275 by %c1_i32_43 dim 2 : vector<2x8x128xf32>, i32 -> vector<2x8x128xf32>
    %279 = vector.shape_cast %277 : vector<8x1xf32> to vector<1x8x1xf32>
    %280 = vector.broadcast %279 : vector<1x8x1xf32> to vector<2x8x128xf32>
    %281 = arith.mulf %280, %278 : vector<2x8x128xf32>
    %282 = vector.extract_strided_slice %2 {offsets = [6, 1, 0, 0], sizes = [1, 1, 8, 1], strides = [1, 1, 1, 1]} : vector<8x3x8x1xf32> to vector<1x1x8x1xf32>
    %283 = vector.shape_cast %282 : vector<1x1x8x1xf32> to vector<8x1xf32>
    %284 = vector.shape_cast %283 : vector<8x1xf32> to vector<1x8x1xf32>
    %285 = vector.broadcast %284 : vector<1x8x1xf32> to vector<2x8x128xf32>
    %286 = arith.mulf %285, %275 : vector<2x8x128xf32>
    %287 = vector.extract_strided_slice %2 {offsets = [6, 2, 0, 0], sizes = [1, 1, 8, 1], strides = [1, 1, 1, 1]} : vector<8x3x8x1xf32> to vector<1x1x8x1xf32>
    %288 = vector.shape_cast %287 : vector<1x1x8x1xf32> to vector<8x1xf32>
    %c127_i32_44 = arith.constant 127 : i32
    %289 = tpu.dynamic_rotate %275 by %c127_i32_44 dim 2 : vector<2x8x128xf32>, i32 -> vector<2x8x128xf32>
    %290 = vector.shape_cast %288 : vector<8x1xf32> to vector<1x8x1xf32>
    %291 = vector.broadcast %290 : vector<1x8x1xf32> to vector<2x8x128xf32>
    %292 = arith.mulf %291, %289 : vector<2x8x128xf32>
    %293 = arith.addf %270, %281 : vector<2x8x128xf32>
    %294 = arith.addf %271, %286 : vector<2x8x128xf32>
    %295 = arith.addf %272, %292 : vector<2x8x128xf32>
    %296 = vector.extract_strided_slice %137 {offsets = [0, 7, 0], sizes = [2, 1, 128], strides = [1, 1, 1]} : vector<2x8x128xf32> to vector<2x1x128xf32>
    %297 = vector.shape_cast %296 : vector<2x1x128xf32> to vector<2x1x128xf32>
    %298 = vector.broadcast %297 : vector<2x1x128xf32> to vector<2x8x128xf32>
    %299 = vector.extract_strided_slice %2 {offsets = [7, 0, 0, 0], sizes = [1, 1, 8, 1], strides = [1, 1, 1, 1]} : vector<8x3x8x1xf32> to vector<1x1x8x1xf32>
    %300 = vector.shape_cast %299 : vector<1x1x8x1xf32> to vector<8x1xf32>
    %c1_i32_45 = arith.constant 1 : i32
    %301 = tpu.dynamic_rotate %298 by %c1_i32_45 dim 2 : vector<2x8x128xf32>, i32 -> vector<2x8x128xf32>
    %302 = vector.shape_cast %300 : vector<8x1xf32> to vector<1x8x1xf32>
    %303 = vector.broadcast %302 : vector<1x8x1xf32> to vector<2x8x128xf32>
    %304 = arith.mulf %303, %301 : vector<2x8x128xf32>
    %305 = vector.extract_strided_slice %2 {offsets = [7, 1, 0, 0], sizes = [1, 1, 8, 1], strides = [1, 1, 1, 1]} : vector<8x3x8x1xf32> to vector<1x1x8x1xf32>
    %306 = vector.shape_cast %305 : vector<1x1x8x1xf32> to vector<8x1xf32>
    %307 = vector.shape_cast %306 : vector<8x1xf32> to vector<1x8x1xf32>
    %308 = vector.broadcast %307 : vector<1x8x1xf32> to vector<2x8x128xf32>
    %309 = arith.mulf %308, %298 : vector<2x8x128xf32>
    %310 = vector.extract_strided_slice %2 {offsets = [7, 2, 0, 0], sizes = [1, 1, 8, 1], strides = [1, 1, 1, 1]} : vector<8x3x8x1xf32> to vector<1x1x8x1xf32>
    %311 = vector.shape_cast %310 : vector<1x1x8x1xf32> to vector<8x1xf32>
    %c127_i32_46 = arith.constant 127 : i32
    %312 = tpu.dynamic_rotate %298 by %c127_i32_46 dim 2 : vector<2x8x128xf32>, i32 -> vector<2x8x128xf32>
    %313 = vector.shape_cast %311 : vector<8x1xf32> to vector<1x8x1xf32>
    %314 = vector.broadcast %313 : vector<1x8x1xf32> to vector<2x8x128xf32>
    %315 = arith.mulf %314, %312 : vector<2x8x128xf32>
    %316 = arith.addf %293, %304 : vector<2x8x128xf32>
    %317 = arith.addf %294, %309 : vector<2x8x128xf32>
    %318 = arith.addf %295, %315 : vector<2x8x128xf32>
    %319 = vector.broadcast %7 : vector<1x1x128xf32> to vector<2x8x128xf32>
    %320 = arith.mulf %316, %319 : vector<2x8x128xf32>
    %321 = arith.addf %317, %320 : vector<2x8x128xf32>
    %322 = vector.broadcast %11 : vector<1x1x128xf32> to vector<2x8x128xf32>
    %323 = arith.mulf %318, %322 : vector<2x8x128xf32>
    %324 = arith.addf %321, %323 : vector<2x8x128xf32>
    %c0_47 = arith.constant 0 : index
    %c0_48 = arith.constant 0 : index
    %c0_49 = arith.constant 0 : index
    %325 = vector.load %arg5[%c0_47, %c0_48, %c0_49] : memref<1x8x1xf32, #tpu.memory_space<vmem>>, vector<1x8x1xf32>
    %c0_50 = arith.constant 0 : index
    %c0_51 = arith.constant 0 : index
    %c0_52 = arith.constant 0 : index
    %326 = vector.load %arg6[%c0_50, %c0_51, %c0_52] : memref<1x8x1xf32, #tpu.memory_space<vmem>>, vector<1x8x1xf32>
    %cst_53 = arith.constant dense<0.000000e+00> : vector<2x8xf32>
    %327 = vector.multi_reduction <add>, %324, %cst_53 [2] : vector<2x8x128xf32> to vector<2x8xf32>
    %328 = vector.shape_cast %327 : vector<2x8xf32> to vector<2x8x1xf32>
    %cst_54 = arith.constant dense<0.000000e+00> : vector<8x1xf32>
    %329 = vector.multi_reduction <add>, %328, %cst_54 [0] : vector<2x8x1xf32> to vector<8x1xf32>
    %330 = vector.shape_cast %329 : vector<8x1xf32> to vector<1x8x1xf32>
    %331 = arith.mulf %324, %324 : vector<2x8x128xf32>
    %cst_55 = arith.constant dense<0.000000e+00> : vector<2x8xf32>
    %332 = vector.multi_reduction <add>, %331, %cst_55 [2] : vector<2x8x128xf32> to vector<2x8xf32>
    %333 = vector.shape_cast %332 : vector<2x8xf32> to vector<2x8x1xf32>
    %cst_56 = arith.constant dense<0.000000e+00> : vector<8x1xf32>
    %334 = vector.multi_reduction <add>, %333, %cst_56 [0] : vector<2x8x1xf32> to vector<8x1xf32>
    %335 = vector.shape_cast %334 : vector<8x1xf32> to vector<1x8x1xf32>
    %cst_57 = arith.constant 3.906250e-03 : f32
    %336 = vector.broadcast %cst_57 : f32 to vector<1x8x1xf32>
    %337 = arith.mulf %330, %336 : vector<1x8x1xf32>
    %cst_58 = arith.constant 3.906250e-03 : f32
    %338 = vector.broadcast %cst_58 : f32 to vector<1x8x1xf32>
    %339 = arith.mulf %335, %338 : vector<1x8x1xf32>
    %340 = arith.mulf %337, %337 : vector<1x8x1xf32>
    %341 = arith.subf %339, %340 : vector<1x8x1xf32>
    %cst_59 = arith.constant 0.000000e+00 : f32
    %342 = vector.broadcast %cst_59 : f32 to vector<1x8x1xf32>
    %343 = arith.maximumf %341, %342 : vector<1x8x1xf32>
    %cst_60 = arith.constant 9.99999974E-6 : f32
    %344 = vector.broadcast %cst_60 : f32 to vector<1x8x1xf32>
    %345 = arith.addf %343, %344 : vector<1x8x1xf32>
    %346 = math.rsqrt %345 : vector<1x8x1xf32>
    %347 = arith.mulf %325, %346 : vector<1x8x1xf32>
    %348 = arith.mulf %337, %347 : vector<1x8x1xf32>
    %349 = arith.subf %326, %348 : vector<1x8x1xf32>
    %350 = vector.broadcast %347 : vector<1x8x1xf32> to vector<2x8x128xf32>
    %351 = arith.mulf %324, %350 : vector<2x8x128xf32>
    %352 = vector.broadcast %349 : vector<1x8x1xf32> to vector<2x8x128xf32>
    %353 = arith.addf %351, %352 : vector<2x8x128xf32>
    %cst_61 = arith.constant 0.000000e+00 : f32
    %354 = vector.broadcast %cst_61 : f32 to vector<2x8x128xf32>
    %355 = arith.maximumf %353, %354 : vector<2x8x128xf32>
    %c0_62 = arith.constant 0 : index
    %c0_63 = arith.constant 0 : index
    %c0_64 = arith.constant 0 : index
    %356 = vector.load %arg7[%c0_62, %c0_63, %c0_64] : memref<2x8x128xf32, #tpu.memory_space<vmem>>, vector<2x8x128xf32>
    tpu.vector_store %arg7[%c0_62, %c0_63, %c0_64], %355 {strides = array<i32>} : memref<2x8x128xf32, #tpu.memory_space<vmem>>, vector<2x8x128xf32>,
    return
  }
}

</mosaic_0001>

<bundles_post_ra>
// kernel: tpu_custom_call.1
= control target key start
LH: loop header
LB: loop body
LE: loop exit
PB: predicated region body
PF: predicated region fallthrough
CT: control target
= control target key end

     0   :  { %v730_v2 = vmov 0   ;;  %s1134_s0 = inlined_call_operand.vmem [shape: f32[2,4,128], index: 0, kind: input, shape index: {}]   ;;  %s1135_s1 = inlined_call_operand.vmem [shape: f32[4,3,8,1], index: 1, kind: input, shape index: {}]   ;;  %s1136_s2 = inlined_call_operand.vmem [shape: f32[1,8,1], index: 2, kind: input, shape index: {}]   ;;  %s1137_s3 = inlined_call_operand.vmem [shape: f32[1,8,1], index: 3, kind: input, shape index: {}]   ;;  %s1138_s4 = inlined_call_operand.vmem [shape: f32[8,3,8,1], index: 4, kind: input, shape index: {}]   ;;  %s1139_s5 = inlined_call_operand.vmem [shape: f32[1,8,1], index: 5, kind: input, shape index: {}]   ;;  %s1140_s6 = inlined_call_operand.vmem [shape: f32[1,8,1], index: 6, kind: input, shape index: {}]   ;;  %s1141_s7 = inlined_call_operand.hbm [shape: f32[2,8,128], index: 7, kind: output, shape index: {}]  }
   0x1   :  { %v30_v0 = vld [vmem:[%s1135_s1 + $0x8] sm:$0xff]  ;;  %v29_v1 = vld [vmem:[%s1135_s1] sm:$0xff]  ;;  %701 = vset.pattern.permute.xlu1 %v730_v2  ;;  %700 = vset.pattern.permute.xlu0 %v730_v2  ;;  %v31_v3 = vld [vmem:[%s1135_s1 + $0x10] sm:$0xff] }
   0x2   :  { %94 = vperm.xlu1 %701, %v30_v0   ;;  %87 = vperm.xlu0 %700, %v29_v1   ;;  %v32_v4 = vld [vmem:[%s1135_s1 + $0x18] sm:$0xff] }
   0x3   :  { %12 = vsyncpa [#allocation3], 0  ;;  %v34_v5 = vld [vmem:[%s1135_s1 + $0x28] sm:$0xff]  ;;  %v33_v6 = vld [vmem:[%s1135_s1 + $0x20] sm:$0xff]  ;;  %v65_v7 = vlaneseq  ;;  %s731_s29 = smov 1   ;;  %v733_v58 = vmov 0.0  }
   0x4   :  { %v36_v8 = vld [vmem:[%s1135_s1 + $0x38] sm:$0xff]  ;;  %v35_v9 = vld [vmem:[%s1135_s1 + $0x30] sm:$0xff]  ;;  %v38_v11 = vld [vmem:[%s1135_s1 + $0x48] sm:$0xff]  ;;  %s734_s11 = smov [#allocation2]  }
   0x5   :  { %v802_v10 = vshrl.u32 %v65_v7, 7  ;;  %v37_v12 = vld [vmem:[%s1135_s1 + $0x40] sm:$0xff]  ;;  %v40_v13 = vld [vmem:[%s1135_s1 + $0x58] sm:$0xff]  ;;  %v39_v15 = vld [vmem:[%s1135_s1 + $0x50] sm:$0xff]  ;;  %v66_v49 = vand.u32 127, %v65_v7  ;;  %s680_s12 = sshll.u32 %s734_s11, 4  ;;  %s681_s12 = int_to_ptr.vmem [resolvable:$true] %s680_s12 }
   0x6   :  { %105 = vperm.xlu1 %701, %v31_v3   ;;  %124 = vperm.xlu0 %700, %v32_v4   ;;  %v28_v16 = vld [vmem:[%s1134_s0 + $0x4] sm:$0xf]  ;;  %v27_v17 = vld [vmem:[%s1134_s0] sm:$0xf]  ;;  %s732_s0 = smov 127   ;;  %p711_p1 = scmp.lt.s32.totalorder %s681_s12, %s681_s12 }
   0x7   :  { %v814_v14 = vsub.s32 0, %v802_v10  ;;  %v828_v20 = vsub.s32 1, %v802_v10  ;;  %v839_v23 = vsub.s32 2, %v802_v10  ;;  %v848_v26 = vsub.s32 3, %v802_v10 }
   0x8   :  { %vm67_vm0 = vcmp.gt.s32.totalorder %v66_v49, 0  ;;  %vm70_vm1 = vcmp.lt.s32.totalorder %v66_v49, 127 }
   0x9   :  { %v80_v18 = vrot.slane %v28_v16, %v814_v14  ;;  %v76_v19 = vrot.slane %v27_v17, %v814_v14  ;;  %v117_v21 = vrot.slane %v28_v16, %v828_v20  ;;  %v113_v22 = vrot.slane %v27_v17, %v828_v20 }
   0xa   :  { %142 = vperm.xlu1 %701, %v34_v5   ;;  %131 = vperm.xlu0 %700, %v33_v6   ;;  %v160_v24 = vrot.slane %v28_v16, %v839_v23  ;;  %v156_v25 = vrot.slane %v27_v17, %v839_v23  ;;  %v853_v27 = vrot.slane %v28_v16, %v848_v26  ;;  %v867_v59 = vsel %vm67_vm0, 1.0, %v733_v58 }
   0xb   :  { %v856_v28 = vrot.slane %v27_v17, %v848_v26 }
   0xe   :  { %174 = vperm.xlu1 %701, %v36_v8   ;;  %167 = vperm.xlu0 %700, %v35_v9  }
  0x12   :  { %210 = vperm.xlu1 %701, %v38_v11   ;;  %185 = vperm.xlu0 %700, %v37_v12  }
  0x16   :  { %228 = vperm.xlu1 %701, %v40_v13   ;;  %217 = vperm.xlu0 %700, %v39_v15  }
  0x1a   :  { %83 = vrot.lane.b32.xlu1 %v80_v18, %s731_s29  ;;  %81 = vrot.lane.b32.xlu0 %v76_v19, %s731_s29 }
  0x1e   :  { %120 = vrot.lane.b32.xlu1 %v117_v21, %s731_s29  ;;  %118 = vrot.lane.b32.xlu0 %v113_v22, %s731_s29 }
  0x22   :  { %101 = vrot.lane.b32.xlu1 %v80_v18, %s732_s0  ;;  %99 = vrot.lane.b32.xlu0 %v76_v19, %s732_s0 }
  0x26   :  { %138 = vrot.lane.b32.xlu1 %v117_v21, %s732_s0  ;;  %136 = vrot.lane.b32.xlu0 %v113_v22, %s732_s0 }
  0x2a   :  { %163 = vrot.lane.b32.xlu1 %v160_v24, %s731_s29  ;;  %161 = vrot.lane.b32.xlu0 %v156_v25, %s731_s29 }
  0x2e   :  { %181 = vrot.lane.b32.xlu1 %v160_v24, %s732_s0  ;;  %179 = vrot.lane.b32.xlu0 %v156_v25, %s732_s0 }
  0x32   :  { %206 = vrot.lane.b32.xlu1 %v853_v27, %s731_s29  ;;  %204 = vrot.lane.b32.xlu0 %v856_v28, %s731_s29 }
  0x36   :  { %224 = vrot.lane.b32.xlu1 %v853_v27, %s732_s0  ;;  %222 = vrot.lane.b32.xlu0 %v856_v28, %s732_s0 }
  0x81   :  { %v95_v29 = vpop.permute.xlu1 %94  ;;  %v88_v30 = vpop.permute.xlu0 %87 }
  0x82   :  { %v97_v54 = vmul.f32 %v95_v29, %v76_v19  ;;  %v98_v55 = vmul.f32 %v95_v29, %v80_v18 }
  0x85   :  { %v106_v31 = vpop.permute.xlu1 %105  ;;  %v125_v32 = vpop.permute.xlu0 %124 }
  0x89   :  { %v143_v33 = vpop.permute.xlu1 %142  ;;  %v132_v34 = vpop.permute.xlu0 %131 }
  0x8a   :  { %v134_v0 = vmul.f32 %v132_v34, %v113_v22  ;;  %v135_v1 = vmul.f32 %v132_v34, %v117_v21 }
  0x8c   :  { %v149_v29 = vadd.f32 %v134_v0, %v97_v54  ;;  %v41_v54 = vld [vmem:[%s1138_s4] sm:$0xff]  ;;  %v52_v0 = vld [vmem:[%s1138_s4 + $0x58] sm:$0xff] }
  0x8d   :  { %v175_v35 = vpop.permute.xlu1 %174  ;;  %v168_v36 = vpop.permute.xlu0 %167 }
  0x8e   :  { %v177_v4 = vmul.f32 %v175_v35, %v156_v25  ;;  %v178_v5 = vmul.f32 %v175_v35, %v160_v24 }
  0x90   :  { %v192_v34 = vadd.f32 %v177_v4, %v149_v29  ;;  %v248_v29 = vld [vmem:[%s1137_s3] sm:$0xff] }
  0x91   :  { %v211_v37 = vpop.permute.xlu1 %210  ;;  %v186_v38 = vpop.permute.xlu0 %185 }
  0x95   :  { %v229_v39 = vpop.permute.xlu1 %228  ;;  %v218_v40 = vpop.permute.xlu0 %217 }
  0x96   :  { %v221_v24 = vmul.f32 %v218_v40, %v853_v27 }
  0x99   :  { %v84_v41 = vpop.permute.xlu1 %83  ;;  %v82_v42 = vpop.permute.xlu0 %81 }
  0x9a   :  { %v91_v60 = vmul.f32 %v88_v30, %v84_v41  ;;  %v90_v61 = vmul.f32 %v88_v30, %v82_v42  ;;  %v150_v30 = vadd.f32 %v135_v1, %v98_v55  ;;  %v44_v55 = vld [vmem:[%s1138_s4 + $0x18] sm:$0xff]  ;;  %v49_v1 = vld [vmem:[%s1138_s4 + $0x40] sm:$0xff] }
  0x9d   :  { %v121_v43 = vpop.permute.xlu1 %120  ;;  %v119_v44 = vpop.permute.xlu0 %118 }
  0x9e   :  { %v128_v52 = vmul.f32 %v125_v32, %v121_v43  ;;  %v127_v53 = vmul.f32 %v125_v32, %v119_v44  ;;  %v220_v32 = vmul.f32 %v218_v40, %v856_v28 }
  0xa0   :  { %v148_v6 = vadd.f32 %v128_v52, %v91_v60  ;;  %v147_v7 = vadd.f32 %v127_v53, %v90_v61  ;;  %v235_v28 = vadd.f32 %v220_v32, %v192_v34  ;;  %v48_v60 = vld [vmem:[%s1138_s4 + $0x38] sm:$0xff]  ;;  %v45_v61 = vld [vmem:[%s1138_s4 + $0x20] sm:$0xff] }
  0xa1   :  { %v102_v45 = vpop.permute.xlu1 %101  ;;  %v100_v46 = vpop.permute.xlu0 %99  ;;  %v56_v32 = vld [vmem:[%s1138_s4 + $0x78] sm:$0xff] }
  0xa2   :  { %v109_v8 = vmul.f32 %v106_v31, %v102_v45  ;;  %v108_v9 = vmul.f32 %v106_v31, %v100_v46  ;;  %v193_v31 = vadd.f32 %v178_v5, %v150_v30  ;;  %v874_v45 = vsel %vm70_vm1, 1.0, %v733_v58  ;;  %v42_v58 = vld [vmem:[%s1138_s4 + $0x8] sm:$0xff]  ;;  %v60_v34 = vld [vmem:[%s1138_s4 + $0x98] sm:$0xff] }
  0xa4   :  { %v236_v46 = vadd.f32 %v221_v24, %v193_v31  ;;  %v53_v24 = vld [vmem:[%s1138_s4 + $0x60] sm:$0xff] }
  0xa5   :  { %v139_v47 = vpop.permute.xlu1 %138  ;;  %v137_v48 = vpop.permute.xlu0 %136  ;;  %v57_v31 = vld [vmem:[%s1138_s4 + $0x80] sm:$0xff] }
  0xa6   :  { %v146_v2 = vmul.f32 %v143_v33, %v139_v47  ;;  %v145_v3 = vmul.f32 %v143_v33, %v137_v48 }
  0xa8   :  { %v152_v22 = vadd.f32 %v146_v2, %v109_v8  ;;  %v151_v21 = vadd.f32 %v145_v3, %v108_v9  ;;  %v51_v2 = vld [vmem:[%s1138_s4 + $0x50] sm:$0xff] }
  0xa9   :  { %v164_v50 = vpop.permute.xlu1 %163  ;;  %v162_v51 = vpop.permute.xlu0 %161 }
  0xaa   :  { %v171_v62 = vmul.f32 %v168_v36, %v164_v50  ;;  %v170_v63 = vmul.f32 %v168_v36, %v162_v51 }
  0xac   :  { %v191_v16 = vadd.f32 %v171_v62, %v148_v6  ;;  %v190_v17 = vadd.f32 %v170_v63, %v147_v7  ;;  %v50_v62 = vld [vmem:[%s1138_s4 + $0x48] sm:$0xff]  ;;  %v47_v63 = vld [vmem:[%s1138_s4 + $0x30] sm:$0xff] }
  0xad   :  { %v182_v56 = vpop.permute.xlu1 %181  ;;  %v180_v57 = vpop.permute.xlu0 %179 }
  0xae   :  { %v189_v11 = vmul.f32 %v186_v38, %v182_v56  ;;  %v188_v12 = vmul.f32 %v186_v38, %v180_v57  ;;  %v43_v56 = vld [vmem:[%s1138_s4 + $0x10] sm:$0xff]  ;;  %v46_v57 = vld [vmem:[%s1138_s4 + $0x28] sm:$0xff] }
  0xb0   :  { %v195_v35 = vadd.f32 %v189_v11, %v152_v22  ;;  %v194_v36 = vadd.f32 %v188_v12, %v151_v21  ;;  %v54_v22 = vld [vmem:[%s1138_s4 + $0x68] sm:$0xff] }
  0xb1   :  { %v207_v13 = vpop.permute.xlu1 %206  ;;  %v205_v15 = vpop.permute.xlu0 %204 }
  0xb2   :  { %v214_v18 = vmul.f32 %v211_v37, %v207_v13  ;;  %v213_v19 = vmul.f32 %v211_v37, %v205_v15 }
  0xb4   :  { %v234_v25 = vadd.f32 %v214_v18, %v191_v16  ;;  %v233_v33 = vadd.f32 %v213_v19, %v190_v17  ;;  %v247_v17 = vld [vmem:[%s1136_s2] sm:$0xff] }
  0xb5   :  { %v225_v38 = vpop.permute.xlu1 %224  ;;  %v223_v41 = vpop.permute.xlu0 %222 }
  0xb6   :  { %v240_v42 = vmul.f32 %v867_v59, %v234_v25  ;;  %v239_v37 = vmul.f32 %v867_v59, %v233_v33  ;;  %v232_v43 = vmul.f32 %v229_v39, %v225_v38  ;;  %v231_v44 = vmul.f32 %v229_v39, %v223_v41  ;;  %v58_v25 = vld [vmem:[%s1138_s4 + $0x88] sm:$0xff]  ;;  %v55_v33 = vld [vmem:[%s1138_s4 + $0x70] sm:$0xff]  ;;  %v64_v38 = vld [vmem:[%s1138_s4 + $0xb8] sm:$0xff] }
  0xb7   :  { %v61_v41 = vld [vmem:[%s1138_s4 + $0xa0] sm:$0xff] }
  0xb8   :  { %v238_v27 = vadd.f32 %v232_v43, %v195_v35  ;;  %v237_v40 = vadd.f32 %v231_v44, %v194_v36  ;;  %v242_v50 = vadd.f32 %v240_v42, %v236_v46  ;;  %v241_v51 = vadd.f32 %v239_v37, %v235_v28  ;;  %v62_v35 = vld [vmem:[%s1138_s4 + $0xa8] sm:$0xff]  ;;  %v59_v36 = vld [vmem:[%s1138_s4 + $0x90] sm:$0xff] }
  0xb9   :  { %v63_v42 = vld [vmem:[%s1138_s4 + $0xb0] sm:$0xff] }
  0xba   :  { %v244_v47 = vmul.f32 %v874_v45, %v238_v27  ;;  %v243_v48 = vmul.f32 %v874_v45, %v237_v40 }
  0xbc   :  { %v878_v52 = vadd.f32 %v244_v47, %v242_v50  ;;  %v880_v53 = vadd.f32 %v243_v48, %v241_v51 }
  0xbe   :  { %251 = vadd.xlane.f32.xlu1 %v878_v52  ;;  %249 = vadd.xlane.f32.xlu0 %v880_v53  ;;  %v254_v39 = vmul.f32 %v880_v53, %v880_v53  ;;  %v255_v49 = vmul.f32 %v878_v52, %v878_v52 }
  0xc2   :  { %256 = vadd.xlane.f32.xlu0 %v254_v39 }
  0xc6   :  { %258 = vadd.xlane.f32.xlu0 %v255_v49 }
  0xcf   :  { %301 = vperm.xlu1 %701, %v41_v54  }
  0xd3   :  { %338 = vperm.xlu1 %701, %v44_v55  }
  0xd7   :  { %319 = vperm.xlu1 %701, %v43_v56  }
  0xdb   :  { %356 = vperm.xlu1 %701, %v46_v57  }
  0xdc   :  { %308 = vperm.xlu0 %700, %v42_v58  }
  0xdf   :  { %388 = vperm.xlu1 %701, %v48_v60  }
  0xe0   :  { %345 = vperm.xlu0 %700, %v45_v61   ;;  %v541_v61 = vsub.s32 6, %v802_v10 }
  0xe3   :  { %424 = vperm.xlu1 %701, %v50_v62  }
  0xe4   :  { %381 = vperm.xlu0 %700, %v47_v63  }
  0xe7   :  { %442 = vperm.xlu1 %701, %v52_v0  }
  0xe8   :  { %399 = vperm.xlu0 %700, %v49_v1  }
  0xec   :  { %431 = vperm.xlu0 %700, %v51_v2   ;;  %v455_v2 = vsub.s32 4, %v802_v10 }
 0x14b   :  { %v252_v3 = vpop.xlane.xlu1 %251  ;;  %v250_v4 = vpop.xlane.xlu0 %249 }
 0x14c   :  { %v253_v5 = vadd.f32 %v252_v3, %v250_v4 }
 0x14e   :  { %v261_v7 = vmul.f32 0.00390625, %v253_v5 }
 0x14f   :  { %v257_v6 = vpop.xlane.xlu0 %256  ;;  %v966_v37 = vpop.permute.xlu1 %301 }
 0x150   :  { %v263_v11 = vmul.f32 %v261_v7, %v261_v7 }
 0x153   :  { %v259_v8 = vpop.xlane.xlu0 %258  ;;  %v968_v43 = vpop.permute.xlu1 %338 }
 0x154   :  { %v260_v9 = vadd.f32 %v259_v8, %v257_v6  ;;  %v498_v8 = vsub.s32 5, %v802_v10 }
 0x156   :  { %v262_v12 = vmul.f32 0.00390625, %v260_v9 }
 0x157   :  { %v970_v44 = vpop.permute.xlu1 %319 }
 0x158   :  { %v264_v13 = vsub.f32 %v262_v12, %v263_v11 }
 0x15a   :  { %v265_v15 = vmax.f32 %v264_v13, 0.0 }
 0x15b   :  { %v309_v28 = vpop.permute.xlu0 %308  ;;  %v972_v46 = vpop.permute.xlu1 %356 }
 0x15c   :  { %v266_v16 = vadd.f32 1e-05, %v265_v15 }
 0x15e   :  { %702 = vrsqrt.f32 %v266_v16 }
 0x15f   :  { %v346_v27 = vpop.permute.xlu0 %345  ;;  %v389_v40 = vpop.permute.xlu1 %388 }
 0x163   :  { %v974_v47 = vpop.permute.xlu0 %381  ;;  %v976_v48 = vpop.permute.xlu1 %424 }
 0x167   :  { %v978_v50 = vpop.permute.xlu0 %399  ;;  %v980_v51 = vpop.permute.xlu1 %442 }
 0x168   :  { %v703_v18 = vpop.eup %702 }
 0x169   :  { %v268_v19 = vmul.f32 %v703_v18, %v247_v17 }
 0x16b   :  { %273 = vperm.xlu1 %701, %v268_v19   ;;  %v269_v30 = vmul.f32 %v268_v19, %v261_v7  ;;  %v432_v39 = vpop.permute.xlu0 %431 }
 0x16d   :  { %v270_v21 = vsub.f32 %v248_v29, %v269_v30 }
 0x16f   :  { %474 = vperm.xlu1 %701, %v54_v22   ;;  %280 = vperm.xlu0 %700, %v270_v21  }
 0x173   :  { %510 = vperm.xlu1 %701, %v56_v32   ;;  %467 = vperm.xlu0 %700, %v53_v24  }
 0x177   :  { %528 = vperm.xlu1 %701, %v58_v25   ;;  %485 = vperm.xlu0 %700, %v55_v33  }
 0x17b   :  { %560 = vperm.xlu1 %701, %v60_v34   ;;  %517 = vperm.xlu0 %700, %v57_v31  }
 0x17f   :  { %596 = vperm.xlu1 %701, %v62_v35   ;;  %553 = vperm.xlu0 %700, %v59_v36  }
 0x183   :  { %614 = vperm.xlu1 %701, %v64_v38   ;;  %571 = vperm.xlu0 %700, %v61_v41  }
 0x187   :  { %603 = vperm.xlu0 %700, %v63_v42  }
 0x1ea   :  { %v274_v49 = vpop.permute.xlu1 %273 }
 0x1eb   :  { %v276_v54 = vmul.f32 %v274_v49, %v880_v53  ;;  %v277_v55 = vmul.f32 %v274_v49, %v878_v52 }
 0x1ee   :  { %v475_v56 = vpop.permute.xlu1 %474  ;;  %v281_v57 = vpop.permute.xlu0 %280 }
 0x1ef   :  { %v283_v58 = vadd.f32 %v281_v57, %v276_v54  ;;  %v284_v60 = vadd.f32 %v281_v57, %v277_v55 }
 0x1f1   :  { %v985_v62 = vmax.f32 %v283_v58, 0.0  ;;  %v987_v63 = vmax.f32 %v284_v60, 0.0  ;;  %v584_v58 = vsub.s32 7, %v802_v10 }
 0x1f2   :  { %v989_v0 = vpop.permute.xlu1 %510  ;;  %v991_v1 = vpop.permute.xlu0 %467 }
 0x1f3   :  { %v294_v53 = vrot.slane %v987_v63, %v814_v14  ;;  %v290_v52 = vrot.slane %v985_v62, %v814_v14  ;;  %v331_v3 = vrot.slane %v987_v63, %v828_v20  ;;  %v327_v4 = vrot.slane %v985_v62, %v828_v20 }
 0x1f4   :  { %v1003_v5 = vrot.slane %v985_v62, %v541_v61  ;;  %v370_v6 = vrot.slane %v985_v62, %v839_v23  ;;  %v374_v7 = vrot.slane %v987_v63, %v839_v23  ;;  %v1017_v15 = vrot.slane %v987_v63, %v541_v61 }
 0x1f5   :  { %297 = vrot.lane.b32.xlu0 %v294_v53, %s731_s29  ;;  %v312_v14 = vmul.f32 %v309_v28, %v294_v53  ;;  %295 = vrot.lane.b32.xlu1 %v290_v52, %s731_s29  ;;  %v311_v9 = vmul.f32 %v309_v28, %v290_v52  ;;  %v349_v11 = vmul.f32 %v346_v27, %v331_v3 }
 0x1f6   :  { %v1012_v12 = vpop.permute.xlu1 %528  ;;  %v1014_v20 = vpop.permute.xlu0 %485  ;;  %v348_v13 = vmul.f32 %v346_v27, %v327_v4  ;;  %v392_v16 = vmul.f32 %v389_v40, %v374_v7  ;;  %v413_v23 = vrot.slane %v985_v62, %v848_v26  ;;  %v417_v18 = vrot.slane %v987_v63, %v848_v26 }
 0x1f7   :  { %v364_v17 = vadd.f32 %v349_v11, %v312_v14  ;;  %v456_v19 = vrot.slane %v985_v62, %v455_v2  ;;  %v460_v29 = vrot.slane %v987_v63, %v455_v2  ;;  %v391_v22 = vmul.f32 %v389_v40, %v370_v6 }
 0x1f8   :  { %v363_v30 = vadd.f32 %v348_v13, %v311_v9  ;;  %v434_v21 = vmul.f32 %v432_v39, %v413_v23  ;;  %v499_v32 = vrot.slane %v985_v62, %v498_v8  ;;  %v435_v25 = vmul.f32 %v432_v39, %v417_v18 }
 0x1f9   :  { %334 = vrot.lane.b32.xlu0 %v331_v3, %s731_s29  ;;  %332 = vrot.lane.b32.xlu1 %v327_v4, %s731_s29  ;;  %v407_v24 = vadd.f32 %v392_v16, %v364_v17  ;;  %v477_v33 = vmul.f32 %v475_v56, %v456_v19  ;;  %v478_v35 = vmul.f32 %v475_v56, %v460_v29 }
 0x1fa   :  { %v561_v34 = vpop.permute.xlu1 %560  ;;  %v406_v31 = vadd.f32 %v391_v22, %v363_v30  ;;  %v503_v26 = vrot.slane %v987_v63, %v498_v8  ;;  %v518_v36 = vpop.permute.xlu0 %517  ;;  %v585_v2 = vrot.slane %v985_v62, %v584_v58 }
 0x1fb   :  { %v563_v38 = vmul.f32 %v561_v34, %v1003_v5  ;;  %v564_v41 = vmul.f32 %v561_v34, %v1017_v15  ;;  %v450_v42 = vadd.f32 %v435_v25, %v407_v24  ;;  %v520_v28 = vmul.f32 %v518_v36, %v499_v32 }
 0x1fc   :  { %v449_v27 = vadd.f32 %v434_v21, %v406_v31  ;;  %v521_v40 = vmul.f32 %v518_v36, %v503_v26 }
 0x1fd   :  { %v493_v49 = vadd.f32 %v478_v35, %v450_v42  ;;  %313 = vrot.lane.b32.xlu0 %v290_v52, %s732_s0  ;;  %315 = vrot.lane.b32.xlu1 %v294_v53, %s732_s0  ;;  %v589_v53 = vrot.slane %v987_v63, %v584_v58 }
 0x1fe   :  { %v492_v39 = vadd.f32 %v477_v33, %v449_v27  ;;  %v1033_v54 = vpop.permute.xlu0 %553  ;;  %v1074_v10 = vpop.permute.xlu1 %596 }
 0x1ff   :  { %v536_v55 = vadd.f32 %v521_v40, %v493_v49 }
 0x200   :  { %v535_v56 = vadd.f32 %v520_v28, %v492_v39 }
 0x201   :  { %350 = vrot.lane.b32.xlu0 %v327_v4, %s732_s0  ;;  %352 = vrot.lane.b32.xlu1 %v331_v3, %s732_s0  ;;  %v579_v57 = vadd.f32 %v564_v41, %v536_v55 }
 0x202   :  { %v1038_v60 = vpop.permute.xlu0 %571  ;;  %v578_v61 = vadd.f32 %v563_v38, %v535_v56  ;;  %v1076_v62 = vpop.permute.xlu1 %614 }
 0x205   :  { %375 = vrot.lane.b32.xlu0 %v370_v6, %s731_s29  ;;  %377 = vrot.lane.b32.xlu1 %v374_v7, %s731_s29 }
 0x206   :  { %v604_v52 = vpop.permute.xlu0 %603 }
 0x207   :  { %v606_v8 = vmul.f32 %v604_v52, %v585_v2  ;;  %v607_v14 = vmul.f32 %v604_v52, %v589_v53 }
 0x209   :  { %v1044_v4 = vadd.f32 %v606_v8, %v578_v61  ;;  %v1046_v3 = vadd.f32 %v607_v14, %v579_v57  ;;  %395 = vrot.lane.b32.xlu0 %v374_v7, %s732_s0  ;;  %393 = vrot.lane.b32.xlu1 %v370_v6, %s732_s0 }
 0x20d   :  { %420 = vrot.lane.b32.xlu0 %v417_v18, %s731_s29  ;;  %418 = vrot.lane.b32.xlu1 %v413_v23, %s731_s29 }
 0x211   :  { %436 = vrot.lane.b32.xlu0 %v413_v23, %s732_s0  ;;  %438 = vrot.lane.b32.xlu1 %v417_v18, %s732_s0 }
 0x215   :  { %461 = vrot.lane.b32.xlu0 %v456_v19, %s731_s29  ;;  %463 = vrot.lane.b32.xlu1 %v460_v29, %s731_s29 }
 0x219   :  { %479 = vrot.lane.b32.xlu0 %v456_v19, %s732_s0  ;;  %481 = vrot.lane.b32.xlu1 %v460_v29, %s732_s0 }
 0x21d   :  { %504 = vrot.lane.b32.xlu0 %v499_v32, %s731_s29  ;;  %506 = vrot.lane.b32.xlu1 %v503_v26, %s731_s29 }
 0x221   :  { %522 = vrot.lane.b32.xlu0 %v499_v32, %s732_s0  ;;  %524 = vrot.lane.b32.xlu1 %v503_v26, %s732_s0 }
 0x225   :  { %547 = vrot.lane.b32.xlu0 %v1003_v5, %s731_s29  ;;  %549 = vrot.lane.b32.xlu1 %v1017_v15, %s731_s29 }
 0x229   :  { %565 = vrot.lane.b32.xlu0 %v1003_v5, %s732_s0  ;;  %567 = vrot.lane.b32.xlu1 %v1017_v15, %s732_s0 }
 0x22d   :  { %590 = vrot.lane.b32.xlu0 %v585_v2, %s731_s29  ;;  %592 = vrot.lane.b32.xlu1 %v589_v53, %s731_s29 }
 0x231   :  { %608 = vrot.lane.b32.xlu0 %v585_v2, %s732_s0  ;;  %610 = vrot.lane.b32.xlu1 %v589_v53, %s732_s0 }
 0x267   :  { %v296_v63 = vpop.permute.xlu1 %295  ;;  %v298_v6 = vpop.permute.xlu0 %297 }
 0x268   :  { %v304_v38 = vmul.f32 %v966_v37, %v296_v63  ;;  %v305_v41 = vmul.f32 %v966_v37, %v298_v6 }
 0x26b   :  { %v333_v7 = vpop.permute.xlu1 %332  ;;  %v335_v9 = vpop.permute.xlu0 %334 }
 0x26c   :  { %v341_v31 = vmul.f32 %v968_v43, %v333_v7  ;;  %v342_v35 = vmul.f32 %v968_v43, %v335_v9 }
 0x26e   :  { %v361_v49 = vadd.f32 %v341_v31, %v304_v38  ;;  %v362_v39 = vadd.f32 %v342_v35, %v305_v41 }
 0x26f   :  { %v316_v5 = vpop.permute.xlu1 %315  ;;  %v314_v11 = vpop.permute.xlu0 %313 }
 0x270   :  { %v323_v56 = vmul.f32 %v970_v44, %v316_v5  ;;  %v322_v57 = vmul.f32 %v970_v44, %v314_v11 }
 0x273   :  { %v353_v13 = vpop.permute.xlu1 %352  ;;  %v351_v15 = vpop.permute.xlu0 %350 }
 0x274   :  { %v360_v27 = vmul.f32 %v972_v46, %v353_v13  ;;  %v359_v40 = vmul.f32 %v972_v46, %v351_v15 }
 0x276   :  { %v366_v8 = vadd.f32 %v360_v27, %v323_v56  ;;  %v365_v14 = vadd.f32 %v359_v40, %v322_v57 }
 0x277   :  { %v378_v16 = vpop.permute.xlu1 %377  ;;  %v376_v23 = vpop.permute.xlu0 %375 }
 0x278   :  { %v385_v42 = vmul.f32 %v974_v47, %v378_v16  ;;  %v384_v28 = vmul.f32 %v974_v47, %v376_v23 }
 0x27a   :  { %v405_v2 = vadd.f32 %v385_v42, %v362_v39  ;;  %v404_v53 = vadd.f32 %v384_v28, %v361_v49 }
 0x27b   :  { %v394_v17 = vpop.permute.xlu1 %393  ;;  %v396_v18 = vpop.permute.xlu0 %395 }
 0x27c   :  { %v402_v37 = vmul.f32 %v978_v50, %v394_v17  ;;  %v403_v58 = vmul.f32 %v978_v50, %v396_v18 }
 0x27e   :  { %v408_v9 = vadd.f32 %v402_v37, %v365_v14  ;;  %v409_v5 = vadd.f32 %v403_v58, %v366_v8 }
 0x27f   :  { %v419_v19 = vpop.permute.xlu1 %418  ;;  %v421_v29 = vpop.permute.xlu0 %420 }
 0x280   :  { %v427_v55 = vmul.f32 %v976_v48, %v419_v19  ;;  %v428_v43 = vmul.f32 %v976_v48, %v421_v29 }
 0x282   :  { %v447_v6 = vadd.f32 %v427_v55, %v404_v53  ;;  %v448_v44 = vadd.f32 %v428_v43, %v405_v2 }
 0x283   :  { %v439_v30 = vpop.permute.xlu1 %438  ;;  %v437_v22 = vpop.permute.xlu0 %436 }
 0x284   :  { %v446_v48 = vmul.f32 %v980_v51, %v439_v30  ;;  %v445_v63 = vmul.f32 %v980_v51, %v437_v22 }
 0x286   :  { %v452_v18 = vadd.f32 %v446_v48, %v409_v5  ;;  %v451_v19 = vadd.f32 %v445_v63, %v408_v9 }
 0x287   :  { %v464_v21 = vpop.permute.xlu1 %463  ;;  %v462_v32 = vpop.permute.xlu0 %461 }
 0x288   :  { %v471_v46 = vmul.f32 %v991_v1, %v464_v21  ;;  %v470_v52 = vmul.f32 %v991_v1, %v462_v32 }
 0x28a   :  { %v491_v16 = vadd.f32 %v471_v46, %v448_v44  ;;  %v490_v23 = vadd.f32 %v470_v52, %v447_v6  ;;  %v633_v6 = vld [vmem:[%s1139_s5] sm:$0xff]  ;;  %s706_s5 = scalar_lea.vmem %s681_s12, 256 }
 0x28b   :  { %v482_v24 = vpop.permute.xlu1 %481  ;;  %v480_v25 = vpop.permute.xlu0 %479  ;;  %p707_p0 = scmp.ne.s32.totalorder %s681_s12, %s706_s5  ;;  %p712_p2 = scmp.lt.s32.totalorder %s706_s5, %s706_s5 }
 0x28c   :  { %v489_v11 = vmul.f32 %v1014_v20, %v482_v24  ;;  %v488_v13 = vmul.f32 %v1014_v20, %v480_v25 }
 0x28d   :  { %p713_p3 = por %p712_p2, %p711_p1 }
 0x28e   :  { %v495_v21 = vadd.f32 %v489_v11, %v452_v18  ;;  %v494_v32 = vadd.f32 %v488_v13, %v451_v19 }
 0x28f   :  { %v507_v33 = vpop.permute.xlu1 %506  ;;  %v505_v34 = vpop.permute.xlu0 %504  ;;  %p714_p4 = pnand %p713_p3, %p707_p0 }
 0x290   :  { %v514_v7 = vmul.f32 %v989_v0, %v507_v33  ;;  %v513_v50 = vmul.f32 %v989_v0, %v505_v34 }
 0x292   :  { %v534_v30 = vadd.f32 %v514_v7, %v491_v16  ;;  %v533_v22 = vadd.f32 %v513_v50, %v490_v23  ;;  %v634_v50 = vld [vmem:[%s1140_s6] sm:$0xff] }
 0x293   :  { %v525_v26 = vpop.permute.xlu1 %524  ;;  %v523_v36 = vpop.permute.xlu0 %522 }
 0x294   :  { %v532_v29 = vmul.f32 %v1012_v12, %v525_v26  ;;  %v531_v0 = vmul.f32 %v1012_v12, %v523_v36 }
 0x296   :  { %v538_v38 = vadd.f32 %v532_v29, %v495_v21  ;;  %v537_v26 = vadd.f32 %v531_v0, %v494_v32 }
 0x297   :  { %v550_v61 = vpop.permute.xlu1 %549  ;;  %v548_v47 = vpop.permute.xlu0 %547 }
 0x298   :  { %v557_v17 = vmul.f32 %v1033_v54, %v550_v61  ;;  %v556_v51 = vmul.f32 %v1033_v54, %v548_v47 }
 0x29a   :  { %v577_v34 = vadd.f32 %v557_v17, %v534_v30  ;;  %v576_v31 = vadd.f32 %v556_v51, %v533_v22 }
 0x29b   :  { %v568_v15 = vpop.permute.xlu1 %567  ;;  %v566_v1 = vpop.permute.xlu0 %565 }
 0x29c   :  { %v575_v20 = vmul.f32 %v1038_v60, %v568_v15  ;;  %v574_v24 = vmul.f32 %v1038_v60, %v566_v1 }
 0x29e   :  { %v581_v36 = vadd.f32 %v575_v20, %v538_v38  ;;  %v580_v42 = vadd.f32 %v574_v24, %v537_v26 }
 0x29f   :  { %v593_v25 = vpop.permute.xlu1 %592  ;;  %v591_v33 = vpop.permute.xlu0 %590 }
 0x2a0   :  { %v600_v54 = vmul.f32 %v1074_v10, %v593_v25  ;;  %v599_v35 = vmul.f32 %v1074_v10, %v591_v33 }
 0x2a2   :  { %v620_v41 = vadd.f32 %v600_v54, %v577_v34  ;;  %v619_v12 = vadd.f32 %v599_v35, %v576_v31 }
 0x2a3   :  { %v611_v28 = vpop.permute.xlu1 %610  ;;  %v609_v27 = vpop.permute.xlu0 %608 }
 0x2a4   :  { %v626_v40 = vmul.f32 %v867_v59, %v620_v41  ;;  %v625_v60 = vmul.f32 %v867_v59, %v619_v12  ;;  %v618_v49 = vmul.f32 %v1076_v62, %v611_v28  ;;  %v617_v39 = vmul.f32 %v1076_v62, %v609_v27 }
 0x2a6   :  { %v624_v55 = vadd.f32 %v618_v49, %v581_v36  ;;  %v623_v43 = vadd.f32 %v617_v39, %v580_v42  ;;  %v628_v10 = vadd.f32 %v626_v40, %v1046_v3  ;;  %v627_v56 = vadd.f32 %v625_v60, %v1044_v4 }
 0x2a8   :  { %v630_v57 = vmul.f32 %v874_v45, %v624_v55  ;;  %v629_v37 = vmul.f32 %v874_v45, %v623_v43 }
 0x2aa   :  { %v632_v58 = vadd.f32 %v630_v57, %v628_v10  ;;  %v631_v61 = vadd.f32 %v629_v37, %v627_v56 }
 0x2ac   :  { %637 = vadd.xlane.f32.xlu1 %v632_v58  ;;  %635 = vadd.xlane.f32.xlu0 %v631_v61  ;;  %v640_v47 = vmul.f32 %v631_v61, %v631_v61  ;;  %v641_v59 = vmul.f32 %v632_v58, %v632_v58 }
 0x2b0   :  { %642 = vadd.xlane.f32.xlu0 %v640_v47 }
 0x2b4   :  { %644 = vadd.xlane.f32.xlu0 %v641_v59 }
 0x339   :  { %v638_v2 = vpop.xlane.xlu1 %637  ;;  %v636_v62 = vpop.xlane.xlu0 %635 }
 0x33a   :  { %v639_v53 = vadd.f32 %v638_v2, %v636_v62 }
 0x33c   :  { %v647_v52 = vmul.f32 0.00390625, %v639_v53 }
 0x33d   :  { %v643_v46 = vpop.xlane.xlu0 %642 }
 0x33e   :  { %v649_v4 = vmul.f32 %v647_v52, %v647_v52 }
 0x341   :  { %v645_v3 = vpop.xlane.xlu0 %644 }
 0x342   :  { %v646_v8 = vadd.f32 %v645_v3, %v643_v46 }
 0x344   :  { %v648_v14 = vmul.f32 0.00390625, %v646_v8 }
 0x346   :  { %v650_v48 = vsub.f32 %v648_v14, %v649_v4 }
 0x348   :  { %v651_v63 = vmax.f32 %v650_v48, 0.0 }
 0x34a   :  { %v652_v45 = vadd.f32 1e-05, %v651_v63 }
 0x34c   :  { %704 = vrsqrt.f32 %v652_v45 }
 0x356   :  { %v705_v44 = vpop.eup %704 }
 0x357   :  { %v654_v7 = vmul.f32 %v705_v44, %v633_v6 }
 0x359   :  { %659 = vperm.xlu1 %701, %v654_v7   ;;  %v655_v9 = vmul.f32 %v654_v7, %v647_v52 }
 0x35b   :  { %v656_v5 = vsub.f32 %v634_v50, %v655_v9 }
 0x35d   :  { %666 = vperm.xlu0 %700, %v656_v5  }
 0x3d8   :  { %v660_v11 = vpop.permute.xlu1 %659 }
 0x3d9   :  { %v662_v13 = vmul.f32 %v660_v11, %v631_v61  ;;  %v663_v15 = vmul.f32 %v660_v11, %v632_v58 }
 0x3dc   :  { %v667_v1 = vpop.permute.xlu0 %666 }
 0x3dd   :  { %v669_v16 = vadd.f32 %v667_v1, %v662_v13  ;;  %v670_v23 = vadd.f32 %v667_v1, %v663_v15 }
 0x3df   :  { %v671_v17 = vmax.f32 %v669_v16, 0.0  ;;  %v672_v51 = vmax.f32 %v670_v23, 0.0 }
 0x3e1   :  { %673 = vst [vmem:[#allocation2] sm:$0xff] %v671_v17  ;;  %674 = vst [vmem:[#allocation2 + $0x8] sm:$0xff] %v672_v51 }
 0x3e2   :  { %717 = shalt.err (!%p714_p4)
}
 0x3e3   :  { %s718_s14 = scalar_lea.hbm %s1141_s7, 256 }
 0x3e4   :  { %p719_p5 = scmp.ne.s32.totalorder %s1141_s7, %s718_s14  ;;  %p722_p6 = scmp.lt.u32.totalorder %s718_s14, %s1141_s7 }
 0x3e6   :  { %p724_p7 = pnand %p722_p6, %p719_p5 }
 0x3e8   :  { %727 = shalt.err (!%p724_p7)
}
 0x3e9   :  { %s735_s17 = smov 128   ;;  %s736_s18 = smov 8  }
 0x3ea   :  { %686 = dma.vmem_to_hbm [thread:$0]  %s681_s12, 256, %s1141_s7, [#allocation3], %s735_s17, %s735_s17, %s736_s18  }
 0x3eb   :  { %728 = dma.done.wait [#allocation3], 256  }
 0x3ec   :  { %729 = vsyncadd [#allocation3], 4294967040 }
 0x3ed   :  { %690 = vsyncpa [#allocation3], 1 }

</bundles_post_ra>
